<compile_context>
chip_gen: v5e
topology: v5e:2x2
jax: 0.10.0
libtpu: 0.0.40
codegen_flags: <defaults>
</compile_context>

<pallas_src>
import math
import functools

import jax
import jax.numpy as jnp
from jax.experimental import pallas as pl
from jax.experimental.pallas import tpu as pltpu


# ------------------------------- Pallas kernel --------------------------------

def _pos_encoding_kernel(x_ref, pe_ref, o_ref):
    # x_ref : (TS, B, D)   pe_ref : (TS, 1, D)   o_ref : (TS, B, D)
    # out = x + pe, with pe broadcast over the batch (second-minor) axis.
    # Dropout(p=0.1) is identity in eval mode.
    # TODO(synk): training-mode dropout would draw a keep-mask with pltpu.prng_random_bits.
    o_ref[...] = x_ref[...] + pe_ref[...]


@functools.partial(jax.jit, static_argnames=("seq_tile",))
def positional_encoding(x, pe, *, seq_tile=None):
    """x: (S, B, D) float32, pe: (max_len, 1, D) float32 -> x + pe[:S] (eval-mode forward)."""
    S, B, D = x.shape
    max_len = pe.shape[0]
    assert S <= max_len, "sequence longer than the positional-encoding table"
    if seq_tile is None:
        seq_tile = S if S <= 256 else 256   # whole problem fits VMEM at these sizes
    assert S % seq_tile == 0

    grid = (S // seq_tile,)
    return pl.pallas_call(
        _pos_encoding_kernel,
        grid=grid,
        in_specs=[
            pl.BlockSpec((seq_tile, B, D), lambda i: (i, 0, 0)),
            # Reads only rows [i*seq_tile, (i+1)*seq_tile) of the (max_len, 1, D) buffer,
            # i.e. exactly pe[:S] tile-by-tile -- no host-side slice needed.
            pl.BlockSpec((seq_tile, 1, D), lambda i: (i, 0, 0)),
        ],
        out_specs=pl.BlockSpec((seq_tile, B, D), lambda i: (i, 0, 0)),
        out_shape=jax.ShapeDtypeStruct((S, B, D), jnp.float32),
        compiler_params=pltpu.CompilerParams(dimension_semantics=("arbitrary",)),
    )(x, pe)


# ------------------------- sinusoidal table (torch __init__) -------------------

def build_pe_table(d_model, max_len=128):
    position = jnp.arange(max_len, dtype=jnp.float32)[:, None]
    div_term = jnp.exp(jnp.arange(0, d_model, 2, dtype=jnp.float32)
                       * (-math.log(10000.0) / d_model))
    pe = jnp.zeros((max_len, d_model), jnp.float32)
    pe = pe.at[:, 0::2].set(jnp.sin(position * div_term))
    pe = pe.at[:, 1::2].set(jnp.cos(position * div_term))
    # unsqueeze(0).transpose(0, 1)  ->  (max_len, 1, d_model)
    return pe[:, None, :]


# ------------------------------------ main -------------------------------------

if __name__ == "__main__":
    SEQ_LEN, BATCH, D_MODEL, MAX_LEN = 8, 2, 128, 128

    key = jax.random.PRNGKey(0)
    x = jax.random.normal(key, (SEQ_LEN, BATCH, D_MODEL), dtype=jnp.float32)
    pe = build_pe_table(D_MODEL, MAX_LEN)

    out = jax.block_until_ready(positional_encoding(x, pe))

    # pure-JAX reference (dropout is identity in eval mode)
    ref = x + pe[:SEQ_LEN]

    assert out.shape == (SEQ_LEN, BATCH, D_MODEL), out.shape
    assert bool(jnp.all(jnp.isfinite(out)))
    assert bool(jnp.allclose(out, ref, atol=1e-6, rtol=1e-6))
    print("KERNEL_OK")
</pallas_src>

<mosaic_0001>
module attributes {stable_mosaic.version = 11 : i64} {
  func.func @_pos_encoding_kernel(%arg0: i32, %arg1: memref<8x2x128xf32, #tpu.memory_space<vmem>>, %arg2: memref<8x1x128xf32, #tpu.memory_space<vmem>>, %arg3: memref<8x2x128xf32, #tpu.memory_space<vmem>>) attributes {dimension_semantics = [#tpu.dimension_semantics<arbitrary>], iteration_bounds = array<i64: 1>, scalar_prefetch = 0 : i64, scratch_operands = 0 : i64, tpu.core_type = #tpu.core_type<tc>, window_params = [{transform_indices = @transform_0, window_bounds = array<i64: 8, 2, 128>}, {transform_indices = @transform_1, window_bounds = array<i64: 8, 1, 128>}, {transform_indices = @transform_2, window_bounds = array<i64: 8, 2, 128>}]} {
    %c0 = arith.constant 0 : index
    %c0_0 = arith.constant 0 : index
    %c0_1 = arith.constant 0 : index
    %0 = vector.load %arg1[%c0, %c0_0, %c0_1] : memref<8x2x128xf32, #tpu.memory_space<vmem>>, vector<8x2x128xf32>
    %c0_2 = arith.constant 0 : index
    %c0_3 = arith.constant 0 : index
    %c0_4 = arith.constant 0 : index
    %1 = vector.load %arg2[%c0_2, %c0_3, %c0_4] : memref<8x1x128xf32, #tpu.memory_space<vmem>>, vector<8x1x128xf32>
    %2 = vector.broadcast %1 : vector<8x1x128xf32> to vector<8x2x128xf32>
    %3 = arith.addf %0, %2 : vector<8x2x128xf32>
    %c0_5 = arith.constant 0 : index
    %c0_6 = arith.constant 0 : index
    %c0_7 = arith.constant 0 : index
    %4 = vector.load %arg3[%c0_5, %c0_6, %c0_7] : memref<8x2x128xf32, #tpu.memory_space<vmem>>, vector<8x2x128xf32>
    tpu.vector_store %arg3[%c0_5, %c0_6, %c0_7], %3 {strides = array<i32>} : memref<8x2x128xf32, #tpu.memory_space<vmem>>, vector<8x2x128xf32>,
    return
  }
  func.func @transform_0(%arg0: i32) -> (i32, i32, i32) {
    %c0_i32 = arith.constant 0 : i32
    %c0_i32_0 = arith.constant 0 : i32
    %c0_i32_1 = arith.constant 0 : i32
    return %arg0, %c0_i32, %c0_i32_0 : i32, i32, i32
  }
  func.func @transform_1(%arg0: i32) -> (i32, i32, i32) {
    %c0_i32 = arith.constant 0 : i32
    %c0_i32_0 = arith.constant 0 : i32
    %c0_i32_1 = arith.constant 0 : i32
    return %arg0, %c0_i32, %c0_i32_0 : i32, i32, i32
  }
  func.func @transform_2(%arg0: i32) -> (i32, i32, i32) {
    %c0_i32 = arith.constant 0 : i32
    %c0_i32_0 = arith.constant 0 : i32
    %c0_i32_1 = arith.constant 0 : i32
    return %arg0, %c0_i32, %c0_i32_0 : i32, i32, i32
  }
}

</mosaic_0001>

<bundles_post_ra>
// kernel: positional_encoding.1
= control target key start
LH: loop header
LB: loop body
LE: loop exit
PB: predicated region body
PF: predicated region fallthrough
CT: control target
= control target key end

     0   :  { %7 = vsyncpa [#allocation3], 0  ;;  %s257_s0 = inlined_call_operand.hbm [shape: f32[8,2,128], index: 0, kind: input, shape index: {}]   ;;  %s258_s1 = inlined_call_operand.hbm [shape: f32[128,1,128], index: 1, kind: input, shape index: {}]   ;;  %s259_s2 = inlined_call_operand.hbm [shape: f32[8,2,128], index: 2, kind: output, shape index: {}]  }
   0x1   :  { %8 = vsyncpa [#allocation6], 0 }
   0x2   :  { %9 = vsyncpa [#allocation4], 0  ;;  %s14_s11 = sshll.u32 %s257_s0, 4  ;;  %s213_s12 = smov [#allocation2]   ;;  %s15_s11 = int_to_ptr.hbm [resolvable:$true] %s14_s11 }
   0x3   :  { %s16_s13 = sshll.u32 %s213_s12, 4  ;;  %s27_s16 = sshll.u32 %s258_s1, 4  ;;  %s17_s13 = int_to_ptr.vmem [resolvable:$true] %s16_s13  ;;  %s28_s16 = int_to_ptr.hbm [resolvable:$true] %s27_s16 }
   0x4   :  { %s214_s17 = smov 32   ;;  %s215_s18 = smov 2  }
   0x5   :  { %22 = dma.hbm_to_vmem [thread:$0]  %s15_s11, 256, %s17_s13, [#allocation3], %s214_s17, %s214_s17, %s215_s18  }
   0x6   :  { %s216_s19 = smov [#allocation5]   ;;  %s217_s21 = smov 16  }
   0x7   :  { %s29_s20 = sshll.u32 %s216_s19, 4  ;;  %s218_s0 = smov 1   ;;  %s30_s20 = int_to_ptr.vmem [resolvable:$true] %s29_s20 }
   0x8   :  { %35 = dma.hbm_to_vmem [thread:$0]  %s28_s16, 128, %s30_s20, [#allocation6], %s217_s21, %s217_s21, %s218_s0  }
   0x9   :  { %207 = dma.done.wait [#allocation3], 256  }
   0xa   :  { %208 = vsyncadd [#allocation3], 4294967040 }
   0xb   :  { %209 = dma.done.wait [#allocation6], 128  }
   0xc   :  { %210 = vsyncadd [#allocation6], 4294967168  ;;  %s219_s22 = smov [#allocation7]   ;;  %s106_s25 = sshll.u32 %s259_s2, 4  ;;  %v44_v0 = vld [vmem:[#allocation2] sm:$0x3]  ;;  %s107_s25 = int_to_ptr.hbm [resolvable:$true] %s106_s25 }
   0xd   :  { %s244_s23 = sshll.u32 %s219_s22, 4  ;;  %v127_v1 = vld [vmem:[#allocation5] ss:$0 sm:$0xff]  ;;  %v45_v2 = vld [vmem:[#allocation2 + $0x2] sm:$0x3]  ;;  %s105_s23 = int_to_ptr.vmem [resolvable:$true] %s244_s23 }
   0xe   :  { %v128_v3 = vld [vmem:[#allocation5 + $0x1] ss:$0 sm:$0xff]  ;;  %v84_v4 = vadd.f32 %v127_v1, %v44_v0  ;;  %v46_v5 = vld [vmem:[#allocation2 + $0x4] sm:$0x3]  ;;  %v129_v6 = vld [vmem:[#allocation5 + $0x2] ss:$0 sm:$0xff] }
   0xf   :  { %v85_v7 = vadd.f32 %v128_v3, %v45_v2  ;;  %v47_v8 = vld [vmem:[#allocation2 + $0x6] sm:$0x3]  ;;  %v130_v9 = vld [vmem:[#allocation5 + $0x3] ss:$0 sm:$0xff]  ;;  %v86_v10 = vadd.f32 %v129_v6, %v46_v5  ;;  %v48_v11 = vld [vmem:[#allocation2 + $0x8] sm:$0x3] }
  0x10   :  { %92 = vst [vmem:[#allocation7] sm:$0x3] %v84_v4  ;;  %v87_v12 = vadd.f32 %v130_v9, %v47_v8  ;;  %v131_v13 = vld [vmem:[#allocation5 + $0x4] ss:$0 sm:$0xff]  ;;  %v49_v14 = vld [vmem:[#allocation2 + $0xa] sm:$0x3] }
  0x11   :  { %93 = vst [vmem:[#allocation7 + $0x2] sm:$0x3] %v85_v7  ;;  %v132_v15 = vld [vmem:[#allocation5 + $0x5] ss:$0 sm:$0xff]  ;;  %v88_v16 = vadd.f32 %v131_v13, %v48_v11  ;;  %v50_v17 = vld [vmem:[#allocation2 + $0xc] sm:$0x3] }
  0x12   :  { %94 = vst [vmem:[#allocation7 + $0x4] sm:$0x3] %v86_v10  ;;  %v89_v18 = vadd.f32 %v132_v15, %v49_v14  ;;  %v133_v19 = vld [vmem:[#allocation5 + $0x6] ss:$0 sm:$0xff]  ;;  %v51_v20 = vld [vmem:[#allocation2 + $0xe] sm:$0x3] }
  0x13   :  { %95 = vst [vmem:[#allocation7 + $0x6] sm:$0x3] %v87_v12  ;;  %v134_v21 = vld [vmem:[#allocation5 + $0x7] ss:$0 sm:$0xff]  ;;  %v90_v22 = vadd.f32 %v133_v19, %v50_v17 }
  0x14   :  { %96 = vst [vmem:[#allocation7 + $0x8] sm:$0x3] %v88_v16  ;;  %v91_v23 = vadd.f32 %v134_v21, %v51_v20 }
  0x15   :  { %97 = vst [vmem:[#allocation7 + $0xa] sm:$0x3] %v89_v18 }
  0x16   :  { %98 = vst [vmem:[#allocation7 + $0xc] sm:$0x3] %v90_v22 }
  0x17   :  { %99 = vst [vmem:[#allocation7 + $0xe] sm:$0x3] %v91_v23 }
  0x18   :  { %112 = dma.vmem_to_hbm [thread:$0]  %s105_s23, 256, %s107_s25, [#allocation4], %s214_s17, %s214_s17, %s215_s18  }
  0x19   :  { %211 = dma.done.wait [#allocation4], 256  }
  0x1a   :  { %212 = vsyncadd [#allocation4], 4294967040 }
  0x1b   :  { %117 = vsyncpa [#allocation3], 1 }
  0x1c   :  { %118 = vsyncpa [#allocation6], 1 }
  0x1d   :  { %119 = vsyncpa [#allocation4], 1 }

</bundles_post_ra>
